<compile_context>
chip_gen: v6e
topology: v6e:2x2x1
jax: 0.10.0
libtpu: 0.0.40
codegen_flags: <defaults>
</compile_context>

<pallas_src>
import functools

import jax
import jax.numpy as jnp
from jax.experimental import pallas as pl
from jax.experimental.pallas import tpu as pltpu

EPS = 1e-6


def _high_order_kernel(x_ref, w_ref, b_ref, o_ref, *, n):
    """x_ref: [TM, F], w_ref: [(n-1)*F, TN] bf16, b_ref: [1, TN] f32,
    o_ref: [TM, TN] f32."""
    x = x_ref[...].astype(jnp.float32)                       # [TM, F]

    # max-abs normalization along the feature axis (PyTorch dim=1, keepdim=True).
    amax = jnp.max(jnp.abs(x), axis=1, keepdims=True)        # [TM, 1]
    inv = pl.reciprocal(amax + EPS, approx=False)            # exact; [TM,1] only
    xn = x * inv                                             # [TM, F]

    # Monomial basis for degrees 1..n-1, cast to bf16 per power (matmul input
    # is bf16 anyway; halves the concat copy), chained multiply kept in f32.
    powers = []
    p = xn
    for k in range(1, n):                                    # n static -> unrolled
        powers.append(p.astype(jnp.bfloat16))
        if k + 1 < n:
            p = p * xn
    basis = jnp.concatenate(powers, axis=-1)                 # [TM, (n-1)*F] bf16

    # Single MXU pass over K = (n-1)*F, f32 accumulation; degree-0 bias on VPU.
    acc = jnp.dot(basis, w_ref[...], preferred_element_type=jnp.float32)
    o_ref[...] = (acc + b_ref[...]).astype(o_ref.dtype)


def high_order_layer_forward(x, w, *, block_b=256, block_o=2048):
    """x: [B, F], w: [n, F, O] float32 -> [B, O] float32."""
    B, F = x.shape
    n, Fw, O = w.shape
    assert F == Fw
    assert n >= 2, "polynomial layer needs at least one non-constant basis term"

    # Degree-0 basis term is a pure bias: ones(F) @ W[0] == W[0].sum(axis=0).
    bias = jnp.sum(w[0].astype(jnp.float32), axis=0)                    # [O]

    # Flatten degrees 1..n-1 into one contraction dim K = (n-1)*F (bf16 weights).
    K = (n - 1) * F
    w2 = w[1:].reshape(K, O)

    # Lane-pad the output dim to a multiple of 128 (unmasked vst, full MXU lanes).
    O_pad = pl.cdiv(O, 128) * 128
    w2p = jnp.pad(w2, ((0, 0), (0, O_pad - O))).astype(jnp.bfloat16)    # [K, O_pad]
    biasp = jnp.pad(bias, (0, O_pad - O)).reshape(1, O_pad)             # [1, O_pad]

    # Batch tile: multiple of 16 (bf16 packs 16 sublanes/vreg); big-batch default 256.
    if B <= block_b:
        TM = max(16, pl.cdiv(B, 16) * 16)
    else:
        TM = block_b
    B_pad = pl.cdiv(B, TM) * TM
    # Pad only if strictly needed; no wrapper dtype cast (kernel upcasts in VMEM).
    xp = x if B_pad == B else jnp.pad(x, ((0, B_pad - B), (0, 0)))      # [B_pad, F]

    # Output tile: stream weight column tiles so the (K, TN) bf16 slab stays
    # well under scoped VMEM on every generation (v5e 16 MiB / v7x 32 MiB).
    weight_tile_budget = 8 << 20
    TN = O_pad
    if TN > block_o or K * TN * 2 > weight_tile_budget:
        TN = min(block_o, TN)
        while TN > 128 and (O_pad % TN or K * TN * 2 > weight_tile_budget):
            TN -= 128
    Gi, Gj = B_pad // TM, O_pad // TN

    # Weight / bias blocks are grid-invariant when there is a single output
    # tile: single-buffer them (no double-buffered copy of the dominant slab).
    wb_mode = pl.Buffered(1) if Gj == 1 else None
    w_bufs = 1 if Gj == 1 else 2

    # Explicit VMEM budget (tiles + basis/power temporaries, with headroom).
    x_isz = jnp.dtype(xp.dtype).itemsize
    vmem_bytes = (2 * TM * F * x_isz                 # x, double-buffered
                  + w_bufs * (K * TN * 2 + TN * 4)   # weight + bias tiles
                  + 2 * TM * TN * 4                  # f32 output, double-buffered
                  + TM * K * 2                       # bf16 basis concat
                  + 2 * TM * F * 4)                  # f32 xn + running power
    vmem_limit = int(min(max(2 * vmem_bytes + (2 << 20), 16 << 20), 64 << 20))

    cost = pl.CostEstimate(
        flops=2 * B_pad * K * O_pad,
        transcendentals=0,
        bytes_accessed=int(xp.size) * x_isz + int(w2p.size) * 2
                       + int(biasp.size) * 4 + B_pad * O_pad * 4,
    )

    kernel = functools.partial(_high_order_kernel, n=n)
    out = pl.pallas_call(
        kernel,
        out_shape=jax.ShapeDtypeStruct((B_pad, O_pad), jnp.float32),
        grid=(Gi, Gj),
        in_specs=[
            pl.BlockSpec((TM, F), lambda i, j: (i, 0)),       # batch-tiled activations
            pl.BlockSpec((K, TN), lambda i, j: (0, j),        # weight column tile
                         pipeline_mode=wb_mode),
            pl.BlockSpec((1, TN), lambda i, j: (0, j),        # bias column tile
                         pipeline_mode=wb_mode),
        ],
        out_specs=pl.BlockSpec((TM, TN), lambda i, j: (i, j)),
        compiler_params=pltpu.CompilerParams(
            dimension_semantics=("parallel", "parallel"),
            vmem_limit_bytes=vmem_limit),
        cost_estimate=cost,
    )(xp, w2p, biasp)
    return out[:B, :O]


def reference_forward(x, w):
    """Pure-JAX f32 reference (monomial basis) for correctness checking."""
    amax = jnp.max(jnp.abs(x), axis=1, keepdims=True)
    xn = x / (amax + EPS)
    n = w.shape[0]
    basis = jnp.stack([xn ** k for k in range(n)], axis=0)    # [n, B, F]
    return jnp.einsum("nbf,nfo->bo", basis, w)


if __name__ == "__main__":
    # Small shapes consistent with the FC-style forward:
    # batch=8, in_features=32, out_features=16, polynomial order n=4.
    B, F, O, N = 8, 32, 16, 4

    key = jax.random.PRNGKey(0)
    kx, kw = jax.random.split(key)
    x = jax.random.normal(kx, (B, F), dtype=jnp.float32)
    # deterministic parameter init (the module's __init__ would create the
    # high-order layer's per-(basis, in, out) coefficients)
    w = jax.random.normal(kw, (N, F, O), dtype=jnp.float32) * 0.1

    y = high_order_layer_forward(x, w)
    y = jax.block_until_ready(y)

    y_ref = reference_forward(x, w)
    assert y.shape == (B, O)
    # Looser tolerance: bf16 matmul inputs.
    assert jnp.allclose(y, y_ref, atol=5e-2, rtol=5e-2), "mismatch vs reference"

    print("KERNEL_OK")
</pallas_src>

<mosaic_0001>
module attributes {stable_mosaic.version = 11 : i64} {
  func.func @_high_order_kernel(%arg0: i32, %arg1: i32, %arg2: memref<16x32xf32, #tpu.memory_space<vmem>>, %arg3: memref<96x128xbf16, #tpu.memory_space<vmem>>, %arg4: memref<1x128xf32, #tpu.memory_space<vmem>>, %arg5: memref<16x128xf32, #tpu.memory_space<vmem>>) attributes {dimension_semantics = [#tpu.dimension_semantics<parallel>, #tpu.dimension_semantics<parallel>], iteration_bounds = array<i64: 1, 1>, scalar_prefetch = 0 : i64, scratch_operands = 0 : i64, tpu.core_type = #tpu.core_type<tc>, window_params = [{transform_indices = @transform_0, window_bounds = array<i64: 16, 32>}, {pipeline_mode = #tpu.pipeline_mode<synchronous>, transform_indices = @transform_1, window_bounds = array<i64: 96, 128>}, {pipeline_mode = #tpu.pipeline_mode<synchronous>, transform_indices = @transform_2, window_bounds = array<i64: 1, 128>}, {transform_indices = @transform_3, window_bounds = array<i64: 16, 128>}]} {
    %c0 = arith.constant 0 : index
    %c0_0 = arith.constant 0 : index
    %0 = vector.load %arg2[%c0, %c0_0] : memref<16x32xf32, #tpu.memory_space<vmem>>, vector<16x32xf32>
    %1 = math.absf %0 : vector<16x32xf32>
    %cst = arith.constant dense<0xFF800000> : vector<16xf32>
    %2 = vector.multi_reduction <maximumf>, %1, %cst [1] : vector<16x32xf32> to vector<16xf32>
    %3 = vector.shape_cast %2 : vector<16xf32> to vector<16x1xf32>
    %cst_1 = arith.constant 9.99999997E-7 : f32
    %4 = vector.broadcast %cst_1 : f32 to vector<16x1xf32>
    %5 = arith.addf %3, %4 : vector<16x1xf32>
    %6 = tpu.reciprocal %5 : vector<16x1xf32> -> vector<16x1xf32>
    %7 = vector.broadcast %6 : vector<16x1xf32> to vector<16x32xf32>
    %8 = arith.mulf %0, %7 : vector<16x32xf32>
    %9 = arith.truncf %8 : vector<16x32xf32> to vector<16x32xbf16>
    %10 = arith.mulf %8, %8 : vector<16x32xf32>
    %11 = arith.truncf %10 : vector<16x32xf32> to vector<16x32xbf16>
    %12 = arith.mulf %10, %8 : vector<16x32xf32>
    %13 = arith.truncf %12 : vector<16x32xf32> to vector<16x32xbf16>
    %14 = tpu.concatenate %9, %11, %13 in 1 : vector<16x32xbf16>, vector<16x32xbf16>, vector<16x32xbf16> -> vector<16x96xbf16>
    %c0_2 = arith.constant 0 : index
    %c0_3 = arith.constant 0 : index
    %15 = vector.load %arg3[%c0_2, %c0_3] : memref<96x128xbf16, #tpu.memory_space<vmem>>, vector<96x128xbf16>
    %cst_4 = arith.constant dense<0.000000e+00> : vector<16x128xf32>
    %16 = tpu.matmul %14, %15, %cst_4 {dimension_numbers = #tpu.dot_dimension_numbers<[1], [0], [0], [1], [0, 0, 1, 1], [], []>} : vector<16x96xbf16>, vector<96x128xbf16>, vector<16x128xf32> -> vector<16x128xf32>
    %c0_5 = arith.constant 0 : index
    %c0_6 = arith.constant 0 : index
    %17 = vector.load %arg4[%c0_5, %c0_6] : memref<1x128xf32, #tpu.memory_space<vmem>>, vector<1x128xf32>
    %18 = vector.broadcast %17 : vector<1x128xf32> to vector<16x128xf32>
    %19 = arith.addf %16, %18 : vector<16x128xf32>
    %c0_7 = arith.constant 0 : index
    %c0_8 = arith.constant 0 : index
    %20 = vector.load %arg5[%c0_7, %c0_8] : memref<16x128xf32, #tpu.memory_space<vmem>>, vector<16x128xf32>
    tpu.vector_store %arg5[%c0_7, %c0_8], %19 {strides = array<i32>} : memref<16x128xf32, #tpu.memory_space<vmem>>, vector<16x128xf32>,
    return
  }
  func.func @transform_0(%arg0: i32, %arg1: i32) -> (i32, i32) {
    %c0_i32 = arith.constant 0 : i32
    %c0_i32_0 = arith.constant 0 : i32
    return %arg0, %c0_i32 : i32, i32
  }
  func.func @transform_1(%arg0: i32, %arg1: i32) -> (i32, i32) {
    %c0_i32 = arith.constant 0 : i32
    %c0_i32_0 = arith.constant 0 : i32
    return %c0_i32, %arg1 : i32, i32
  }
  func.func @transform_2(%arg0: i32, %arg1: i32) -> (i32, i32) {
    %c0_i32 = arith.constant 0 : i32
    %c0_i32_0 = arith.constant 0 : i32
    return %c0_i32, %arg1 : i32, i32
  }
  func.func @transform_3(%arg0: i32, %arg1: i32) -> (i32, i32) {
    %c0_i32 = arith.constant 0 : i32
    return %arg0, %arg1 : i32, i32
  }
}

</mosaic_0001>

<bundles_post_ra>
// kernel: tpu_custom_call.1
= control target key start
LH: loop header
LB: loop body
LE: loop exit
PB: predicated region body
PF: predicated region fallthrough
CT: control target
= control target key end

     0   :  { %8 = vsyncpa [#allocation3], 0  ;;  %s370_s0 = inlined_call_operand.hbm [shape: f32[16,32], index: 0, kind: input, shape index: {}]   ;;  %s371_s1 = inlined_call_operand.hbm [shape: bf16[96,128], index: 1, kind: input, shape index: {}]   ;;  %s372_s2 = inlined_call_operand.vmem [shape: f32[1,128], index: 2, kind: input, shape index: {}]   ;;  %s373_s3 = inlined_call_operand.hbm [shape: f32[16,128], index: 3, kind: output, shape index: {}]  }
   0x1   :  { %9 = vsyncpa [#allocation6], 0 }
   0x2   :  { %10 = vsyncpa [#allocation4], 0  ;;  %s316_s12 = smov [#allocation2]  }
   0x3   :  { %s16_s13 = sshll.u32 %s316_s12, 4  ;;  %s17_s13 = int_to_ptr.vmem [resolvable:$true] %s16_s13 }
   0x4   :  { %s258_s14 = scalar_lea.vmem %s17_s13, 256  ;;  %p263_p1 = scmp.lt.s32.totalorder %s17_s13, %s17_s13 }
   0x5   :  { %p259_p0 = scmp.ne.s32.totalorder %s17_s13, %s258_s14  ;;  %p264_p2 = scmp.lt.s32.totalorder %s258_s14, %s258_s14 }
   0x7   :  { %p265_p3 = por %p264_p2, %p263_p1 }
   0x9   :  { %p266_p4 = pnand %p265_p3, %p259_p0 }
   0xb   :  { %269 = shalt.err (!%p266_p4)
}
   0xc   :  { %s317_s15 = smov 128   ;;  %s318_s16 = smov 8  }
   0xd   :  { %22 = dma.hbm_to_vmem [thread:$0]  %s370_s0, 256, %s17_s13, [#allocation3], %s317_s15, %s317_s15, %s318_s16  }
   0xe   :  { %s319_s19 = smov [#allocation5]  }
   0xf   :  { %s28_s20 = sshll.u32 %s319_s19, 4  ;;  %s29_s20 = int_to_ptr.vmem [resolvable:$true] %s28_s20 }
  0x10   :  { %s278_s21 = scalar_lea.vmem %s29_s20, 768  ;;  %p283_p6 = scmp.lt.s32.totalorder %s29_s20, %s29_s20 }
  0x11   :  { %p279_p5 = scmp.ne.s32.totalorder %s29_s20, %s278_s21  ;;  %p284_p7 = scmp.lt.s32.totalorder %s278_s21, %s278_s21 }
  0x13   :  { %p285_p8 = por %p284_p7, %p283_p6 }
  0x15   :  { %p286_p9 = pnand %p285_p8, %p279_p5 }
  0x17   :  { %289 = shalt.err (!%p286_p9)
}
  0x18   :  { %s320_s22 = smov 64   ;;  %s321_s23 = smov 4  }
  0x19   :  { %34 = dma.hbm_to_vmem [thread:$0]  %s371_s1, 768, %s29_s20, [#allocation6], %s320_s22, %s320_s22, %s321_s23  }
  0x1a   :  { %310 = dma.done.wait [#allocation3], 256  }
  0x1b   :  { %311 = vsyncadd [#allocation3], 4294967040 }
  0x1c   :  { %312 = dma.done.wait [#allocation6], 768  }
  0x1d   :  { %313 = vsyncadd [#allocation6], 4294966528  ;;  %v44_v0 = vld [vmem:[#allocation2] sm:$0xff]  ;;  %vm48_vm0 = vcmask 261120   ;;  %v45_v1 = vld [vmem:[#allocation2 + $0x8] sm:$0xff]  ;;  %v322_v7 = vmov 0.0  }
  0x1e   :  { %v46_v2 = vand.u32 2147483647, %v44_v0  ;;  %v47_v3 = vand.u32 2147483647, %v45_v1  ;;  %v240_v6 = vld [vmem:[#allocation5 + $0x28] sm:$0xff]   ;;  %214 = vmatprep.subr.bf16.mxu0 %v322_v7  ;;  %v241_v8 = vld [vmem:[#allocation5 + $0x20] sm:$0xff]  }
  0x1f   :  { %215 = vmatpush3.bf16.msra.mxu0 %v240_v6  ;;  %v242_v9 = vld [vmem:[#allocation5 + $0x18] sm:$0xff]   ;;  %v243_v10 = vld [vmem:[#allocation5 + $0x10] sm:$0xff]   ;;  %v244_v11 = vld [vmem:[#allocation5 + $0x8] sm:$0xff]   ;;  %vm323_vm1 = vmmov 0   ;;  %s324_s0 = smov 32   ;;  %vm77_vm2 = vcmask 523264  }
  0x20   :  { %v49_v4 = vsel %vm48_vm0, %v46_v2, -inf  ;;  %v52_v5 = vsel %vm48_vm0, %v47_v3, -inf  ;;  %216 = vmatprep.subr.bf16.mxu0 %v322_v7  ;;  %v245_v16 = vld [vmem:[#allocation5] sm:$0xff]   ;;  %226 = vmatprep.mubr.msk.bf16.mxu0 %vm323_vm1, %v322_v7  ;;  %vm135_vm3 = vcmask 785408   ;;  %v199_v32 = vld [vmem:[%s372_s2] ss:$0 sm:$0xff] }
  0x21   :  { %50 = vmax.xlane.f32.xlu0 %v49_v4  ;;  %s325_s27 = smov [#allocation7]  }
  0x22   :  { %s186_s28 = sshll.u32 %s325_s27, 4  ;;  %s187_s28 = int_to_ptr.vmem [resolvable:$true] %s186_s28 }
  0x23   :  { %217 = vmatpush3.bf16.msra.mxu0 %v241_v8  ;;  %s290_s29 = scalar_lea.vmem %s187_s28, 256  ;;  %p295_p11 = scmp.lt.s32.totalorder %s187_s28, %s187_s28 }
  0x24   :  { %218 = vmatprep.subr.bf16.mxu0 %v322_v7  ;;  %p291_p10 = scmp.ne.s32.totalorder %s187_s28, %s290_s29  ;;  %p296_p12 = scmp.lt.s32.totalorder %s290_s29, %s290_s29 }
  0x25   :  { %53 = vmax.xlane.f32.xlu0 %v52_v5 }
  0x26   :  { %p297_p13 = por %p296_p12, %p295_p11 }
  0x27   :  { %219 = vmatpush3.bf16.msra.mxu0 %v242_v9 }
  0x28   :  { %220 = vmatprep.subr.bf16.mxu0 %v322_v7  ;;  %p298_p0 = pnand %p297_p13, %p291_p10 }
  0x2b   :  { %221 = vmatpush3.bf16.msra.mxu0 %v243_v10 }
  0x2c   :  { %222 = vmatprep.subr.bf16.mxu0 %v322_v7 }
  0x2f   :  { %223 = vmatpush3.bf16.msra.mxu0 %v244_v11 }
  0x30   :  { %224 = vmatprep.subr.bf16.mxu0 %v322_v7 }
  0x33   :  { %225 = vmatpush3.bf16.msra.mxu0 %v245_v16 }
  0xaa   :  { %v51_v12 = vpop.xlane.xlu0 %50 }
  0xab   :  { %v55_v13 = vadd.f32 1e-06, %v51_v12 }
  0xad   :  { %246 = vrcp.f32 %v55_v13 }
  0xae   :  { %v54_v14 = vpop.xlane.xlu0 %53 }
  0xaf   :  { %v56_v15 = vadd.f32 1e-06, %v54_v14 }
  0xb1   :  { %248 = vrcp.f32 %v56_v15 }
  0xba   :  { %v247_v17 = vpop.eup %246 }
  0xbb   :  { %v59_v18 = vmul.f32 %v247_v17, %v44_v0 }
  0xbd   :  { %v62_v21 = vmul.f32 %v59_v18, %v59_v18 }
  0xbe   :  { %v249_v19 = vpop.eup %248 }
  0xbf   :  { %v60_v20 = vmul.f32 %v249_v19, %v45_v1  ;;  %v65_v26 = vmul.f32 %v62_v21, %v59_v18 }
  0xc1   :  { %v63_v22 = vmul.f32 %v60_v20, %v60_v20  ;;  %v61_v23 = vpack.c.bf16 %v60_v20, %v59_v18 }
  0xc3   :  { %v64_v24 = vpack.c.bf16 %v63_v22, %v62_v21  ;;  %v66_v25 = vmul.f32 %v63_v22, %v60_v20 }
  0xc5   :  { %69 = vrot.lane.b32.xlu1 %v64_v24, %s324_s0  ;;  %v67_v27 = vpack.c.bf16 %v66_v25, %v65_v26 }
  0xc9   :  { %72 = vrot.lane.b32.xlu1 %v67_v27, %s320_s22 }
 0x137   :  { %v70_v28 = vpop.permute.xlu1 %69 }
 0x138   :  { %v76_v29 = vsel %vm48_vm0, %v61_v23, %v70_v28 }
 0x13b   :  { %v73_v30 = vpop.permute.xlu1 %72 }
 0x13c   :  { %v79_v31 = vsel %vm77_vm2, %v76_v29, %v73_v30 }
 0x13d   :  { %227 = vmatmul.mubr.msk.bf16.vlgmr.msra.gmra.mxu0 %vm135_vm3, %v79_v31 }
 0x1fd   :  { %v172_v33 = vpop.f32.mrf.mxu0 }
 0x1fe   :  { %v173_v34 = vadd.f32 %v199_v32, %v172_v33 }
 0x1ff   :  { %v228_v35 = vpop.f32.mrf.mxu0 }
 0x200   :  { %179 = vst [vmem:[#allocation7] sm:$0xff] %v173_v34 }
 0x201   :  { %v175_v36 = vpop.f32.mrf.mxu0 }
 0x202   :  { %v176_v37 = vadd.f32 %v199_v32, %v175_v36 }
 0x203   :  { %v229_v38 = vpop.f32.mrf.mxu0 }
 0x204   :  { %180 = vst [vmem:[#allocation7 + $0x8] sm:$0xff] %v176_v37 }
 0x205   :  { %301 = shalt.err (!%p298_p0)
}
 0x206   :  { %192 = dma.vmem_to_hbm [thread:$0]  %s187_s28, 256, %s373_s3, [#allocation4], %s317_s15, %s317_s15, %s318_s16  }
 0x207   :  { %314 = dma.done.wait [#allocation4], 256  }
 0x208   :  { %315 = vsyncadd [#allocation4], 4294967040 }
 0x209   :  { %196 = vsyncpa [#allocation3], 1 }
 0x20a   :  { %197 = vsyncpa [#allocation6], 1 }
 0x20b   :  { %198 = vsyncpa [#allocation4], 1 }

</bundles_post_ra>
